<compile_context>
chip_gen: v6e
topology: v6e:2x2x1
jax: 0.10.0
libtpu: 0.0.40
codegen_flags: <defaults>
</compile_context>

<pallas_src>
import functools
import math

import jax
import jax.numpy as jnp
from jax import lax
from jax.experimental import pallas as pl
from jax.experimental.pallas import tpu as pltpu


_MAX_TILE_Q = 256      # rows per grid step; multiple of 32 -> valid sublane tile for int8/bf16/f32
_NEG_BIG = -1.0e9      # same constant as the PyTorch module


def _matching_matrix_kernel(hk_ref, wnorm_ref, hq_ref, mask_ref, out_ref, *,
                            sim_mode, norm_mode, h_dimension,
                            negative_slope, tau_for_e):
    # Similarity: [TILE_Q, D] x [Nd, D] -> [TILE_Q, Nd]; contract last dims of
    # both operands (no transpose), accumulate in f32 on the MXU.
    scores = lax.dot_general(
        hq_ref[...], hk_ref[...],
        dimension_numbers=(((1,), (1,)), ((), ())),
        preferred_element_type=jnp.float32)

    if sim_mode == 0:
        mm = jnp.exp(scores * (1.0 / tau_for_e))
    elif sim_mode == 1:
        mm = scores * (1.0 / (h_dimension ** 0.5))
    elif sim_mode == 2:
        mm = scores * (1.0 / (h_dimension ** 0.5))
        mm = jnp.where(mm >= 0, mm, negative_slope * mm)      # LeakyReLU
    else:
        raise ValueError("bad sim_mode")

    masked = mask_ref[...] != 0          # int8 mask tile; True = masked out

    if norm_mode in (0, 1):
        if norm_mode == 1:
            # x / sigmoid(w)  ==  x * (1 + exp(-w)); scalar read from SMEM.
            w = wnorm_ref[0]
            mm = mm * (1.0 + jnp.exp(-w))
        # Fused masking: x*inv_mask + mask*(-1e9) == where(mask, -1e9, x)
        # for {0,1} masks.
        mm = jnp.where(masked, _NEG_BIG, mm)
        m = jnp.max(mm, axis=-1, keepdims=True)
        e = jnp.exp(mm - m)
        mm = e * pl.reciprocal(jnp.sum(e, axis=-1, keepdims=True), approx=True)
    elif norm_mode == 2:
        mm = jnp.where(masked, 0.0, mm)
        denom = jnp.sum(mm, axis=-1, keepdims=True)
        # NOTE: like the PyTorch reference, no guard for denom == 0.
        mm = mm * pl.reciprocal(denom, approx=True)
    else:
        raise ValueError("bad norm_mode")

    out_ref[...] = mm.astype(out_ref.dtype)


def matching_matrix(h_da, h_q, mask, W, w_norm, *, sim_mode, norm_mode,
                    negative_slope=0.2, tau_for_e=1.0):
    """Pallas implementation of MatchingMatrix.forward(h_da, h_q, mask)."""
    nq, d = h_q.shape
    nd, _ = h_da.shape

    # sim_mode 0:  h_q @ W @ h_da.T == h_q @ (h_da @ W.T).T.  Fold the DxD
    # projection into the (small, resident) key side ONCE (Nd*D^2 flops total
    # instead of Nq*D^2), done as one tiny XLA matmul in the wrapper.
    if sim_mode == 0:
        hk = lax.dot_general(h_da, W,
                             dimension_numbers=(((1,), (1,)), ((), ())),
                             preferred_element_type=jnp.float32).astype(h_da.dtype)
    else:
        hk = h_da

    # int8 mask: 4x less HBM traffic than float32 for the mask read.
    mask_i8 = (mask != 0).astype(jnp.int8)
    w_norm = w_norm.astype(jnp.float32).reshape((1,))

    # Tile the independent Nq axis (pad to a tile multiple if needed).
    if nq <= _MAX_TILE_Q:
        tile_q, nq_pad = nq, nq
    else:
        tile_q = _MAX_TILE_Q
        nq_pad = pl.cdiv(nq, tile_q) * tile_q
        if nq_pad != nq:
            pad = nq_pad - nq
            h_q = jnp.pad(h_q, ((0, pad), (0, 0)))
            mask_i8 = jnp.pad(mask_i8, ((0, pad), (0, 0)))

    kernel = functools.partial(
        _matching_matrix_kernel,
        sim_mode=sim_mode, norm_mode=norm_mode, h_dimension=d,
        negative_slope=negative_slope, tau_for_e=tau_for_e)

    out = pl.pallas_call(
        kernel,
        out_shape=jax.ShapeDtypeStruct((nq_pad, nd), jnp.float32),
        grid_spec=pltpu.PrefetchScalarGridSpec(
            num_scalar_prefetch=0,
            grid=(nq_pad // tile_q,),
            in_specs=[
                pl.BlockSpec((nd, d), lambda i: (0, 0)),            # keys: resident in VMEM
                pl.BlockSpec(memory_space=pltpu.MemorySpace.SMEM),  # w_norm scalar
                pl.BlockSpec((tile_q, d), lambda i: (i, 0)),        # h_q row tile
                pl.BlockSpec((tile_q, nd), lambda i: (i, 0)),       # mask row tile
            ],
            out_specs=pl.BlockSpec((tile_q, nd), lambda i: (i, 0)),
        ),
        compiler_params=pltpu.CompilerParams(
            dimension_semantics=("parallel",),          # shard rows across TCs on v7x
            vmem_limit_bytes=48 * 1024 * 1024),         # < v7x 64 MiB physical, > 32 MiB default
    )(hk, w_norm, h_q, mask_i8)

    return out[:nq] if nq_pad != nq else out


# ---------------- pure-JAX reference (mirrors the PyTorch code) ----------------
def matching_matrix_ref(h_da, h_q, mask, W, w_norm, *, sim_mode, norm_mode,
                        negative_slope=0.2, tau_for_e=1.0):
    d = h_q.shape[1]
    if sim_mode == 0:
        mm = jnp.exp((h_q @ W @ h_da.T) / tau_for_e)
    elif sim_mode == 1:
        mm = (h_q @ h_da.T) / (d ** 0.5)
    else:
        mm = (h_q @ h_da.T) / (d ** 0.5)
        mm = jnp.where(mm >= 0, mm, negative_slope * mm)
    inv = (mask == 0).astype(jnp.float32)
    if norm_mode == 0:
        mm = mm * inv + mask * (-1.0e9)
        mm = jax.nn.softmax(mm, axis=-1)
    elif norm_mode == 1:
        mm = mm * inv
        mm = mm / jax.nn.sigmoid(w_norm[0])
        mm = mm + mask * (-1.0e9)
        mm = jax.nn.softmax(mm, axis=-1)
    else:
        mm = mm * inv
        mm = mm / jnp.sum(mm, axis=-1, keepdims=True)
    return mm


def _make_inputs(key, nq, nd, d):
    k1, k2, k3 = jax.random.split(key, 3)
    h_q = jax.random.normal(k1, (nq, d), dtype=jnp.float32)
    h_da = jax.random.normal(k2, (nd, d), dtype=jnp.float32)
    bound = math.sqrt(6.0 / (d + d))                    # xavier_uniform for W
    W = jax.random.uniform(k3, (d, d), minval=-bound, maxval=bound,
                           dtype=jnp.float32)
    w_norm = jnp.zeros((1,), dtype=jnp.float32)         # nn.init.constant_(w, 0)
    col = jnp.arange(nd)[None, :]
    row = jnp.arange(nq)[:, None]
    mask = ((col + row) % 3 == 0).astype(jnp.float32)   # 1 = masked out
    return h_da, h_q, mask, W, w_norm


if __name__ == "__main__":
    key = jax.random.PRNGKey(0)
    k_small, k_big = jax.random.split(key)

    def check(inputs, sim_mode, norm_mode, tag):
        h_da, h_q, mask, W, w_norm = inputs
        out = matching_matrix(h_da, h_q, mask, W, w_norm,
                              sim_mode=sim_mode, norm_mode=norm_mode,
                              negative_slope=0.2, tau_for_e=1.0)
        out = jax.block_until_ready(out)
        ref = matching_matrix_ref(h_da, h_q, mask, W, w_norm,
                                  sim_mode=sim_mode, norm_mode=norm_mode,
                                  negative_slope=0.2, tau_for_e=1.0)
        good = bool(jnp.allclose(out, ref, atol=2e-3, rtol=2e-3))
        if not good:
            print(f"MISMATCH {tag} sim_mode={sim_mode} norm_mode={norm_mode}")
        return good

    ok = True

    # Small shapes: every (sim, norm) combination, single-tile grid.
    small = _make_inputs(k_small, 8, 16, 32)
    for sm in (0, 1, 2):
        for nm in (0, 1, 2):
            ok &= check(small, sm, nm, "small")

    # Larger shapes: exercises the multi-tile grid + Nq padding path
    # (Nq=300 -> padded to 512, tile_q=256, grid=(2,)).
    big = _make_inputs(k_big, 300, 128, 64)
    for sm, nm in ((1, 0), (2, 1), (2, 2)):
        ok &= check(big, sm, nm, "big")

    if ok:
        print("KERNEL_OK")
</pallas_src>

<mosaic_0001>
module attributes {stable_mosaic.version = 11 : i64} {
  func.func @_matching_matrix_kernel(%arg0: i32, %arg1: memref<16x32xf32, #tpu.memory_space<vmem>>, %arg2: memref<1xf32, #tpu.memory_space<smem>>, %arg3: memref<8x32xf32, #tpu.memory_space<vmem>>, %arg4: memref<8x16xi8, #tpu.memory_space<vmem>>, %arg5: memref<8x16xf32, #tpu.memory_space<vmem>>) attributes {dimension_semantics = [#tpu.dimension_semantics<parallel>], iteration_bounds = array<i64: 1>, scalar_prefetch = 0 : i64, scratch_operands = 0 : i64, tpu.core_type = #tpu.core_type<tc>, window_params = [{pipeline_mode = #tpu.pipeline_mode<synchronous>, transform_indices = @transform_0, window_bounds = array<i64: 16, 32>}, {transform_indices = @transform_1, window_bounds = array<i64: 1>}, {transform_indices = @transform_2, window_bounds = array<i64: 8, 32>}, {transform_indices = @transform_3, window_bounds = array<i64: 8, 16>}, {transform_indices = @transform_4, window_bounds = array<i64: 8, 16>}]} {
    %c0 = arith.constant 0 : index
    %c0_0 = arith.constant 0 : index
    %0 = vector.load %arg3[%c0, %c0_0] : memref<8x32xf32, #tpu.memory_space<vmem>>, vector<8x32xf32>
    %c0_1 = arith.constant 0 : index
    %c0_2 = arith.constant 0 : index
    %1 = vector.load %arg1[%c0_1, %c0_2] : memref<16x32xf32, #tpu.memory_space<vmem>>, vector<16x32xf32>
    %cst = arith.constant dense<0.000000e+00> : vector<8x16xf32>
    %2 = tpu.matmul %0, %1, %cst {dimension_numbers = #tpu.dot_dimension_numbers<[1], [1], [0], [0], [0, 0, 1, 0], [], []>} : vector<8x32xf32>, vector<16x32xf32>, vector<8x16xf32> -> vector<8x16xf32>
    %cst_3 = arith.constant 1.000000e+00 : f32
    %3 = vector.broadcast %cst_3 : f32 to vector<8x16xf32>
    %4 = arith.mulf %2, %3 : vector<8x16xf32>
    %5 = math.exp %4 : vector<8x16xf32>
    %c0_4 = arith.constant 0 : index
    %c0_5 = arith.constant 0 : index
    %6 = vector.load %arg4[%c0_4, %c0_5] : memref<8x16xi8, #tpu.memory_space<vmem>>, vector<8x16xi8>
    %c0_i8 = arith.constant 0 : i8
    %7 = vector.broadcast %c0_i8 : i8 to vector<8x16xi8>
    %8 = arith.cmpi ne, %6, %7 : vector<8x16xi8>
    %cst_6 = arith.constant -1.000000e+09 : f32
    %9 = vector.broadcast %cst_6 : f32 to vector<8x16xf32>
    %10 = arith.select %8, %9, %5 : vector<8x16xi1>, vector<8x16xf32>
    %cst_7 = arith.constant dense<0xFF800000> : vector<8xf32>
    %11 = vector.multi_reduction <maximumf>, %10, %cst_7 [1] : vector<8x16xf32> to vector<8xf32>
    %12 = vector.shape_cast %11 : vector<8xf32> to vector<8x1xf32>
    %13 = vector.broadcast %12 : vector<8x1xf32> to vector<8x16xf32>
    %14 = arith.subf %10, %13 : vector<8x16xf32>
    %15 = math.exp %14 : vector<8x16xf32>
    %cst_8 = arith.constant dense<0.000000e+00> : vector<8xf32>
    %16 = vector.multi_reduction <add>, %15, %cst_8 [1] : vector<8x16xf32> to vector<8xf32>
    %17 = vector.shape_cast %16 : vector<8xf32> to vector<8x1xf32>
    %18 = tpu.reciprocal %17 {approx = true} : vector<8x1xf32> -> vector<8x1xf32>
    %19 = vector.broadcast %18 : vector<8x1xf32> to vector<8x16xf32>
    %20 = arith.mulf %15, %19 : vector<8x16xf32>
    %c0_9 = arith.constant 0 : index
    %c0_10 = arith.constant 0 : index
    %21 = vector.load %arg5[%c0_9, %c0_10] : memref<8x16xf32, #tpu.memory_space<vmem>>, vector<8x16xf32>
    tpu.vector_store %arg5[%c0_9, %c0_10], %20 {strides = array<i32>} : memref<8x16xf32, #tpu.memory_space<vmem>>, vector<8x16xf32>,
    return
  }
  func.func @transform_0(%arg0: i32) -> (i32, i32) {
    %c0_i32 = arith.constant 0 : i32
    %c0_i32_0 = arith.constant 0 : i32
    %c0_i32_1 = arith.constant 0 : i32
    return %c0_i32, %c0_i32_0 : i32, i32
  }
  func.func @transform_1(%arg0: i32) -> i32 {
    %c0_i32 = arith.constant 0 : i32
    %c0_i32_0 = arith.constant 0 : i32
    return %c0_i32 : i32
  }
  func.func @transform_2(%arg0: i32) -> (i32, i32) {
    %c0_i32 = arith.constant 0 : i32
    %c0_i32_0 = arith.constant 0 : i32
    return %arg0, %c0_i32 : i32, i32
  }
  func.func @transform_3(%arg0: i32) -> (i32, i32) {
    %c0_i32 = arith.constant 0 : i32
    %c0_i32_0 = arith.constant 0 : i32
    return %arg0, %c0_i32 : i32, i32
  }
  func.func @transform_4(%arg0: i32) -> (i32, i32) {
    %c0_i32 = arith.constant 0 : i32
    %c0_i32_0 = arith.constant 0 : i32
    return %arg0, %c0_i32 : i32, i32
  }
}

</mosaic_0001>

<bundles_post_ra>
// kernel: tpu_custom_call.1
= control target key start
LH: loop header
LB: loop body
LE: loop exit
PB: predicated region body
PF: predicated region fallthrough
CT: control target
= control target key end

     0   :  { %10 = vsyncpa [#allocation4], 0  ;;  %s308_s0 = inlined_call_operand.hbm [shape: f32[16,32], index: 0, kind: input, shape index: {}]   ;;  %s309_s1 = inlined_call_operand.<no memory space> [shape: f32[1], index: 1, kind: input, shape index: {}]   ;;  %s310_s2 = inlined_call_operand.hbm [shape: f32[8,32], index: 2, kind: input, shape index: {}]   ;;  %s311_s3 = inlined_call_operand.vmem [shape: s8[8,16], index: 3, kind: input, shape index: {}]   ;;  %s312_s4 = inlined_call_operand.hbm [shape: f32[8,16], index: 4, kind: output, shape index: {}]  }
   0x1   :  { %11 = vsyncpa [#allocation7], 0 }
   0x2   :  { %12 = vsyncpa [#allocation5], 0  ;;  %s260_s15 = smov [#allocation3]  }
   0x3   :  { %s18_s16 = sshll.u32 %s260_s15, 4  ;;  %s19_s16 = int_to_ptr.vmem [resolvable:$true] %s18_s16 }
   0x4   :  { %s202_s17 = scalar_lea.vmem %s19_s16, 256  ;;  %p207_p1 = scmp.lt.s32.totalorder %s19_s16, %s19_s16 }
   0x5   :  { %p203_p0 = scmp.ne.s32.totalorder %s19_s16, %s202_s17  ;;  %p208_p2 = scmp.lt.s32.totalorder %s202_s17, %s202_s17 }
   0x7   :  { %p209_p3 = por %p208_p2, %p207_p1 }
   0x9   :  { %p210_p4 = pnand %p209_p3, %p203_p0 }
   0xb   :  { %213 = shalt.err (!%p210_p4)
}
   0xc   :  { %s261_s1 = smov 128   ;;  %s262_s18 = smov 8  }
   0xd   :  { %24 = dma.hbm_to_vmem [thread:$0]  %s308_s0, 256, %s19_s16, [#allocation4], %s261_s1, %s261_s1, %s262_s18  }
   0xe   :  { %s263_s21 = smov [#allocation6]  }
   0xf   :  { %s33_s22 = sshll.u32 %s263_s21, 4  ;;  %s34_s22 = int_to_ptr.vmem [resolvable:$true] %s33_s22 }
  0x10   :  { %s222_s23 = scalar_lea.vmem %s34_s22, 128  ;;  %p227_p6 = scmp.lt.s32.totalorder %s34_s22, %s34_s22 }
  0x11   :  { %p223_p5 = scmp.ne.s32.totalorder %s34_s22, %s222_s23  ;;  %p228_p7 = scmp.lt.s32.totalorder %s222_s23, %s222_s23 }
  0x13   :  { %p229_p8 = por %p228_p7, %p227_p6 }
  0x15   :  { %p230_p9 = pnand %p229_p8, %p223_p5 }
  0x17   :  { %233 = shalt.err (!%p230_p9)
}
  0x18   :  { %36 = dma.hbm_to_vmem [thread:$0]  %s310_s2, 128, %s34_s22, [#allocation7]  }
  0x19   :  { %254 = dma.done.wait [#allocation4], 256  }
  0x1a   :  { %255 = vsyncadd [#allocation4], 4294967040 }
  0x1b   :  { %256 = dma.done.wait [#allocation7], 128  }
  0x1c   :  { %257 = vsyncadd [#allocation7], 4294967168  ;;  %v264_v0 = vmov 0.0   ;;  %vm265_vm0 = vmmov 0   ;;  %vm50_vm1 = vcmask 261120   ;;  %v49_v1 = vld [vmem:[#allocation3 + $0x8] sm:$0xff] }
  0x1d   :  { %173 = vmatprep.subr.mxu0 %v264_v0  ;;  %177 = vmatprep.mubr.msk.f32.mxu0 %vm265_vm0, %v264_v0  ;;  %v48_v2 = vld [vmem:[#allocation3] sm:$0xff]  ;;  %v47_v3 = vld [vmem:[#allocation6] sm:$0xff]  ;;  %v266_v8 = vmov 0   ;;  %vm138_vm4 = vcmask 130048  }
  0x1e   :  { %174 = vmatpush3.xpose.msk.msra.mxu0 %vm50_vm1, %v49_v1  ;;  %v132_v6 = vld [vmem:[%s311_s3] sm:$0x3]  ;;  %s267_s3 = smov [#allocation8]  }
  0x1f   :  { %175 = vmatprep.subr.mxu0 %v264_v0  ;;  %vm133_vm2 = vnez %v132_v6  ;;  %s157_s26 = sshll.u32 %s267_s3, 4  ;;  %s158_s26 = int_to_ptr.vmem [resolvable:$true] %s157_s26 }
  0x20   :  { %v134_v9 = vsel %vm133_vm2, 16843009, %v266_v8  ;;  %s234_s27 = scalar_lea.vmem %s158_s26, 128  ;;  %p239_p11 = scmp.lt.s32.totalorder %s158_s26, %s158_s26 }
  0x21   :  { %v135_v10 = vunpack.c.0.s8 %v134_v9  ;;  %p235_p10 = scmp.ne.s32.totalorder %s158_s26, %s234_s27  ;;  %p240_p12 = scmp.lt.s32.totalorder %s234_s27, %s234_s27 }
  0x22   :  { %176 = vmatpush3.xpose.msk.msra.mxu0 %vm50_vm1, %v48_v2 }
  0x23   :  { %vm136_vm3 = vcmp.ne.s32.totalorder %v135_v10, 0  ;;  %p241_p13 = por %p240_p12, %p239_p11 }
  0x25   :  { %178 = vmatmul.mubr.msk.f32.vlgmr.msra.gmra.mxu0 %vm50_vm1, %v47_v3  ;;  %p242_p0 = pnand %p241_p13, %p235_p10 }
  0xe5   :  { %v126_v4 = vpop.f32.mrf.mxu0 }
  0xe6   :  { %v130_v5 = vmul.f32 1.442695, %v126_v4 }
  0xe7   :  { %v179_v7 = vpop.f32.mrf.mxu0 }
  0xe8   :  { %188 = vpow2.f32 %v130_v5 }
  0xf5   :  { %v189_v11 = vpop.eup %188 }
  0xf6   :  { %v137_v12 = vsel %vm136_vm3, -1e+09, %v189_v11 }
  0xf7   :  { %v139_v13 = vsel %vm138_vm4, %v137_v12, -inf }
  0xf8   :  { %140 = vmax.xlane.f32.xlu0 %v139_v13 }
 0x181   :  { %v141_v14 = vpop.xlane.xlu0 %140 }
 0x182   :  { %v142_v15 = vsub.f32 %v137_v12, %v141_v14 }
 0x184   :  { %v143_v16 = vmul.f32 1.442695, %v142_v15 }
 0x186   :  { %190 = vpow2.f32 %v143_v16 }
 0x193   :  { %v191_v17 = vpop.eup %190 }
 0x194   :  { %v145_v18 = vsel %vm138_vm4, %v191_v17, 0.0 }
 0x195   :  { %146 = vadd.xlane.f32.xlu0 %v145_v18 }
 0x21e   :  { %v147_v19 = vpop.xlane.xlu0 %146 }
 0x21f   :  { %192 = vrcp.f32 %v147_v19 }
 0x22c   :  { %v193_v20 = vpop.eup %192 }
 0x22d   :  { %v149_v21 = vmul.f32 %v193_v20, %v191_v17 }
 0x22f   :  { %150 = vst.msk [vmem:[#allocation8] sm:$0xff] %vm138_vm4, %v149_v21 }
 0x230   :  { %245 = shalt.err (!%p242_p0)
}
 0x231   :  { %160 = dma.vmem_to_hbm [thread:$0]  %s158_s26, 128, %s312_s4, [#allocation5]  }
 0x232   :  { %258 = dma.done.wait [#allocation5], 128  }
 0x233   :  { %259 = vsyncadd [#allocation5], 4294967168 }
 0x234   :  { %164 = vsyncpa [#allocation4], 1 }
 0x235   :  { %165 = vsyncpa [#allocation7], 1 }
 0x236   :  { %166 = vsyncpa [#allocation5], 1 }

</bundles_post_ra>
